<compile_context>
chip_gen: v5e
topology: v5e:2x2
jax: 0.10.0
libtpu: 0.0.40
codegen_flags: <defaults>
</compile_context>

<pallas_src>
import functools

import jax
import jax.numpy as jnp
from jax.experimental import pallas as pl
from jax.experimental.pallas import tpu as pltpu


# ----------------------------------------------------------------------------
# Fused kernel: normalize x -> cosine sim (MXU) -> top-k mask -> softmax ->
#               weighted read-out of raw memory rows (MXU)
# ----------------------------------------------------------------------------
def _memory_topk_kernel(x_ref, mem_ref, inv_norm_ref, o_ref, *, topk, m_valid, eps):
    x = x_ref[...]                 # (TB, D)  f32
    mem = mem_ref[...]             # (Mp, D)  f32  raw memory (zero-padded rows)
    inv_mn = inv_norm_ref[...]     # (1, Mp)  f32  precomputed 1/max(||mem_i||, eps)

    # --- L2 normalize x (F.normalize semantics) via rsqrt (EUP slot) --------
    sumsq = jnp.sum(x * x, axis=1, keepdims=True)
    x_n = x * jax.lax.rsqrt(jnp.maximum(sumsq, jnp.float32(eps * eps)))

    # --- cosine similarity on the MXU against RAW memory; fold mem norms in -
    sim = jax.lax.dot_general(
        x_n, mem,
        dimension_numbers=(((1,), (1,)), ((), ())),
        preferred_element_type=jnp.float32,
    )                               # (TB, Mp)
    sim = sim * inv_mn              # broadcast (1, Mp)

    neg = jnp.float32(-1e30)
    mp = mem.shape[0]
    if m_valid < mp:
        # mask padded memory columns so they can never enter the top-k
        col = jax.lax.broadcasted_iota(jnp.int32, sim.shape, 1)
        sim = jnp.where(col < m_valid, sim, neg)

    # --- top-k selection: k iterated argmaxes (1 XLU reduce per iteration) --
    work = sim
    smax = None
    for it in range(topk):          # topk is static
        row_max = jnp.max(work, axis=1, keepdims=True)
        if it == 0:
            smax = row_max          # global row max IS in the top-k set
        work = jnp.where(work == row_max, neg, work)

    # --- masked softmax numerator: selected entries are where work != sim ---
    e = jnp.where(work != sim, jnp.exp(sim - smax), 0.0)     # (TB, Mp)

    # --- weighted read-out of RAW memory rows on the MXU; normalize after ---
    acc = jnp.dot(e, mem, preferred_element_type=jnp.float32)  # (TB, D)
    denom = jnp.sum(e, axis=1, keepdims=True)                   # (TB, 1)
    o_ref[...] = (acc * pl.reciprocal(denom, approx=False)).astype(o_ref.dtype)


# ----------------------------------------------------------------------------
# Wrapper
# ----------------------------------------------------------------------------
def memory_module_forward(x, memory, topk=10, block_b=128, eps=1e-12):
    """x:(B,D) f32, memory:(M,D) f32 -> (B,D) f32 (matches MemoryModule.forward)."""
    B, D = x.shape
    M, D2 = memory.shape
    assert D == D2

    # --- host-side precompute (once per call, independent of B) -------------
    inv_mem_norm = 1.0 / jnp.maximum(
        jnp.sqrt(jnp.sum(memory * memory, axis=1)), eps)        # (M,)

    # --- pad memory rows to a lane multiple (128) for dense vregs -----------
    Mp = max(pl.cdiv(M, 128) * 128, 128)
    if Mp != M:
        memory_p = jnp.pad(memory, ((0, Mp - M), (0, 0)))
        inv_mem_norm = jnp.pad(inv_mem_norm, (0, Mp - M))
    else:
        memory_p = memory
    inv_mem_norm = inv_mem_norm.reshape(1, Mp).astype(jnp.float32)

    # --- batch tile: multiple of 8, >=2 grid steps when B allows (v7x 2 TCs) -
    TB = max(8, min(block_b, pl.cdiv(pl.cdiv(B, 2), 8) * 8))
    pad_b = pl.cdiv(B, TB) * TB
    if pad_b != B:
        x = jnp.pad(x, ((0, pad_b - B), (0, 0)))

    # --- VMEM budget: resident memory + double-buffered x/out + headroom ----
    resident = 2 * (Mp * D + Mp) * 4          # memory + inv-norm (worst case 2 bufs)
    streams = 2 * 2 * TB * D * 4              # x and out, double-buffered
    scratch = 8 * TB * Mp * 4                 # top-k working set / spill headroom
    vmem_limit = int(min(max(resident + streams + scratch + (8 << 20), 32 << 20),
                         64 << 20))

    out = pl.pallas_call(
        functools.partial(_memory_topk_kernel, topk=topk, m_valid=M, eps=eps),
        out_shape=jax.ShapeDtypeStruct((pad_b, D), jnp.float32),
        grid=(pad_b // TB,),
        in_specs=[
            pl.BlockSpec((TB, D), lambda i: (i, 0)),      # x tile (streamed)
            pl.BlockSpec((Mp, D), lambda i: (0, 0)),      # raw memory: grid-resident
            pl.BlockSpec((1, Mp), lambda i: (0, 0)),      # inverse mem norms: resident
        ],
        out_specs=pl.BlockSpec((TB, D), lambda i: (i, 0)),  # lane-dense (D=128) output
        compiler_params=pltpu.CompilerParams(
            dimension_semantics=("parallel",),              # batch tiles independent
            vmem_limit_bytes=vmem_limit,
        ),
    )(x, memory_p, inv_mem_norm)
    return out[:B]


# ----------------------------------------------------------------------------
# Pure-JAX reference (mirrors the PyTorch module) for validation
# ----------------------------------------------------------------------------
def memory_module_ref(x, memory, topk=10):
    eps = 1e-12
    m_n = memory / jnp.maximum(jnp.linalg.norm(memory, axis=1, keepdims=True), eps)
    x_n = x / jnp.maximum(jnp.linalg.norm(x, axis=1, keepdims=True), eps)
    sim = x_n @ m_n.T
    vals, idx = jax.lax.top_k(sim, topk)
    w = jax.nn.softmax(vals, axis=1)
    selected = memory[idx]                                 # (B, k, D)
    return jnp.sum(w[..., None] * selected, axis=1)


if __name__ == "__main__":
    key = jax.random.PRNGKey(0)
    kx, km = jax.random.split(key)

    batch, latent_dim, memory_size, topk = 8, 128, 100, 10
    x = jax.random.normal(kx, (batch, latent_dim), jnp.float32)
    memory = jax.random.normal(km, (memory_size, latent_dim), jnp.float32)

    fwd = jax.jit(functools.partial(memory_module_forward, topk=topk))
    out = jax.block_until_ready(fwd(x, memory))

    assert out.shape == (batch, latent_dim), out.shape
    assert out.dtype == jnp.float32
    assert bool(jnp.all(jnp.isfinite(out)))

    ref = memory_module_ref(x, memory, topk)
    max_err = float(jnp.max(jnp.abs(out - ref)))
    assert max_err < 1e-4, f"max |err| = {max_err}"

    print("KERNEL_OK")
</pallas_src>

<mosaic_0001>
module attributes {stable_mosaic.version = 11 : i64} {
  func.func @_memory_topk_kernel(%arg0: i32, %arg1: memref<8x128xf32, #tpu.memory_space<vmem>>, %arg2: memref<128x128xf32, #tpu.memory_space<vmem>>, %arg3: memref<1x128xf32, #tpu.memory_space<vmem>>, %arg4: memref<8x128xf32, #tpu.memory_space<vmem>>) attributes {dimension_semantics = [#tpu.dimension_semantics<parallel>], iteration_bounds = array<i64: 1>, scalar_prefetch = 0 : i64, scratch_operands = 0 : i64, tpu.core_type = #tpu.core_type<tc>, window_params = [{transform_indices = @transform_0, window_bounds = array<i64: 8, 128>}, {pipeline_mode = #tpu.pipeline_mode<synchronous>, transform_indices = @transform_1, window_bounds = array<i64: 128, 128>}, {pipeline_mode = #tpu.pipeline_mode<synchronous>, transform_indices = @transform_2, window_bounds = array<i64: 1, 128>}, {transform_indices = @transform_3, window_bounds = array<i64: 8, 128>}]} {
    %c0 = arith.constant 0 : index
    %c0_0 = arith.constant 0 : index
    %0 = vector.load %arg1[%c0, %c0_0] : memref<8x128xf32, #tpu.memory_space<vmem>>, vector<8x128xf32>
    %c0_1 = arith.constant 0 : index
    %c0_2 = arith.constant 0 : index
    %1 = vector.load %arg2[%c0_1, %c0_2] : memref<128x128xf32, #tpu.memory_space<vmem>>, vector<128x128xf32>
    %c0_3 = arith.constant 0 : index
    %c0_4 = arith.constant 0 : index
    %2 = vector.load %arg3[%c0_3, %c0_4] : memref<1x128xf32, #tpu.memory_space<vmem>>, vector<1x128xf32>
    %3 = arith.mulf %0, %0 : vector<8x128xf32>
    %cst = arith.constant dense<0.000000e+00> : vector<8xf32>
    %4 = vector.multi_reduction <add>, %3, %cst [1] : vector<8x128xf32> to vector<8xf32>
    %5 = vector.shape_cast %4 : vector<8xf32> to vector<8x1xf32>
    %cst_5 = arith.constant 1.000000e-24 : f32
    %6 = vector.broadcast %cst_5 : f32 to vector<8x1xf32>
    %7 = arith.maximumf %5, %6 : vector<8x1xf32>
    %8 = math.rsqrt %7 : vector<8x1xf32>
    %9 = vector.broadcast %8 : vector<8x1xf32> to vector<8x128xf32>
    %10 = arith.mulf %0, %9 : vector<8x128xf32>
    %cst_6 = arith.constant dense<0.000000e+00> : vector<8x128xf32>
    %11 = tpu.matmul %10, %1, %cst_6 {dimension_numbers = #tpu.dot_dimension_numbers<[1], [1], [0], [0], [0, 0, 1, 0], [], []>} : vector<8x128xf32>, vector<128x128xf32>, vector<8x128xf32> -> vector<8x128xf32>
    %12 = vector.broadcast %2 : vector<1x128xf32> to vector<8x128xf32>
    %13 = arith.mulf %11, %12 : vector<8x128xf32>
    %14 = tpu.iota {dimensions = array<i32: 1>} : vector<8x128xi32>
    %c100_i32 = arith.constant 100 : i32
    %15 = vector.broadcast %c100_i32 : i32 to vector<8x128xi32>
    %16 = arith.cmpi slt, %14, %15 : vector<8x128xi32>
    %cst_7 = arith.constant -1.000000e+30 : f32
    %17 = vector.broadcast %cst_7 : f32 to vector<8x128xf32>
    %18 = arith.select %16, %13, %17 : vector<8x128xi1>, vector<8x128xf32>
    %cst_8 = arith.constant dense<0xFF800000> : vector<8xf32>
    %19 = vector.multi_reduction <maximumf>, %18, %cst_8 [1] : vector<8x128xf32> to vector<8xf32>
    %20 = vector.shape_cast %19 : vector<8xf32> to vector<8x1xf32>
    %21 = vector.broadcast %20 : vector<8x1xf32> to vector<8x128xf32>
    %22 = arith.cmpf oeq, %18, %21 : vector<8x128xf32>
    %cst_9 = arith.constant -1.000000e+30 : f32
    %23 = vector.broadcast %cst_9 : f32 to vector<8x128xf32>
    %24 = arith.select %22, %23, %18 : vector<8x128xi1>, vector<8x128xf32>
    %cst_10 = arith.constant dense<0xFF800000> : vector<8xf32>
    %25 = vector.multi_reduction <maximumf>, %24, %cst_10 [1] : vector<8x128xf32> to vector<8xf32>
    %26 = vector.shape_cast %25 : vector<8xf32> to vector<8x1xf32>
    %27 = vector.broadcast %26 : vector<8x1xf32> to vector<8x128xf32>
    %28 = arith.cmpf oeq, %24, %27 : vector<8x128xf32>
    %cst_11 = arith.constant -1.000000e+30 : f32
    %29 = vector.broadcast %cst_11 : f32 to vector<8x128xf32>
    %30 = arith.select %28, %29, %24 : vector<8x128xi1>, vector<8x128xf32>
    %cst_12 = arith.constant dense<0xFF800000> : vector<8xf32>
    %31 = vector.multi_reduction <maximumf>, %30, %cst_12 [1] : vector<8x128xf32> to vector<8xf32>
    %32 = vector.shape_cast %31 : vector<8xf32> to vector<8x1xf32>
    %33 = vector.broadcast %32 : vector<8x1xf32> to vector<8x128xf32>
    %34 = arith.cmpf oeq, %30, %33 : vector<8x128xf32>
    %cst_13 = arith.constant -1.000000e+30 : f32
    %35 = vector.broadcast %cst_13 : f32 to vector<8x128xf32>
    %36 = arith.select %34, %35, %30 : vector<8x128xi1>, vector<8x128xf32>
    %cst_14 = arith.constant dense<0xFF800000> : vector<8xf32>
    %37 = vector.multi_reduction <maximumf>, %36, %cst_14 [1] : vector<8x128xf32> to vector<8xf32>
    %38 = vector.shape_cast %37 : vector<8xf32> to vector<8x1xf32>
    %39 = vector.broadcast %38 : vector<8x1xf32> to vector<8x128xf32>
    %40 = arith.cmpf oeq, %36, %39 : vector<8x128xf32>
    %cst_15 = arith.constant -1.000000e+30 : f32
    %41 = vector.broadcast %cst_15 : f32 to vector<8x128xf32>
    %42 = arith.select %40, %41, %36 : vector<8x128xi1>, vector<8x128xf32>
    %cst_16 = arith.constant dense<0xFF800000> : vector<8xf32>
    %43 = vector.multi_reduction <maximumf>, %42, %cst_16 [1] : vector<8x128xf32> to vector<8xf32>
    %44 = vector.shape_cast %43 : vector<8xf32> to vector<8x1xf32>
    %45 = vector.broadcast %44 : vector<8x1xf32> to vector<8x128xf32>
    %46 = arith.cmpf oeq, %42, %45 : vector<8x128xf32>
    %cst_17 = arith.constant -1.000000e+30 : f32
    %47 = vector.broadcast %cst_17 : f32 to vector<8x128xf32>
    %48 = arith.select %46, %47, %42 : vector<8x128xi1>, vector<8x128xf32>
    %cst_18 = arith.constant dense<0xFF800000> : vector<8xf32>
    %49 = vector.multi_reduction <maximumf>, %48, %cst_18 [1] : vector<8x128xf32> to vector<8xf32>
    %50 = vector.shape_cast %49 : vector<8xf32> to vector<8x1xf32>
    %51 = vector.broadcast %50 : vector<8x1xf32> to vector<8x128xf32>
    %52 = arith.cmpf oeq, %48, %51 : vector<8x128xf32>
    %cst_19 = arith.constant -1.000000e+30 : f32
    %53 = vector.broadcast %cst_19 : f32 to vector<8x128xf32>
    %54 = arith.select %52, %53, %48 : vector<8x128xi1>, vector<8x128xf32>
    %cst_20 = arith.constant dense<0xFF800000> : vector<8xf32>
    %55 = vector.multi_reduction <maximumf>, %54, %cst_20 [1] : vector<8x128xf32> to vector<8xf32>
    %56 = vector.shape_cast %55 : vector<8xf32> to vector<8x1xf32>
    %57 = vector.broadcast %56 : vector<8x1xf32> to vector<8x128xf32>
    %58 = arith.cmpf oeq, %54, %57 : vector<8x128xf32>
    %cst_21 = arith.constant -1.000000e+30 : f32
    %59 = vector.broadcast %cst_21 : f32 to vector<8x128xf32>
    %60 = arith.select %58, %59, %54 : vector<8x128xi1>, vector<8x128xf32>
    %cst_22 = arith.constant dense<0xFF800000> : vector<8xf32>
    %61 = vector.multi_reduction <maximumf>, %60, %cst_22 [1] : vector<8x128xf32> to vector<8xf32>
    %62 = vector.shape_cast %61 : vector<8xf32> to vector<8x1xf32>
    %63 = vector.broadcast %62 : vector<8x1xf32> to vector<8x128xf32>
    %64 = arith.cmpf oeq, %60, %63 : vector<8x128xf32>
    %cst_23 = arith.constant -1.000000e+30 : f32
    %65 = vector.broadcast %cst_23 : f32 to vector<8x128xf32>
    %66 = arith.select %64, %65, %60 : vector<8x128xi1>, vector<8x128xf32>
    %cst_24 = arith.constant dense<0xFF800000> : vector<8xf32>
    %67 = vector.multi_reduction <maximumf>, %66, %cst_24 [1] : vector<8x128xf32> to vector<8xf32>
    %68 = vector.shape_cast %67 : vector<8xf32> to vector<8x1xf32>
    %69 = vector.broadcast %68 : vector<8x1xf32> to vector<8x128xf32>
    %70 = arith.cmpf oeq, %66, %69 : vector<8x128xf32>
    %cst_25 = arith.constant -1.000000e+30 : f32
    %71 = vector.broadcast %cst_25 : f32 to vector<8x128xf32>
    %72 = arith.select %70, %71, %66 : vector<8x128xi1>, vector<8x128xf32>
    %cst_26 = arith.constant dense<0xFF800000> : vector<8xf32>
    %73 = vector.multi_reduction <maximumf>, %72, %cst_26 [1] : vector<8x128xf32> to vector<8xf32>
    %74 = vector.shape_cast %73 : vector<8xf32> to vector<8x1xf32>
    %75 = vector.broadcast %74 : vector<8x1xf32> to vector<8x128xf32>
    %76 = arith.cmpf oeq, %72, %75 : vector<8x128xf32>
    %cst_27 = arith.constant -1.000000e+30 : f32
    %77 = vector.broadcast %cst_27 : f32 to vector<8x128xf32>
    %78 = arith.select %76, %77, %72 : vector<8x128xi1>, vector<8x128xf32>
    %79 = arith.cmpf one, %78, %18 : vector<8x128xf32>
    %80 = vector.broadcast %20 : vector<8x1xf32> to vector<8x128xf32>
    %81 = arith.subf %18, %80 : vector<8x128xf32>
    %82 = math.exp %81 : vector<8x128xf32>
    %cst_28 = arith.constant 0.000000e+00 : f32
    %83 = vector.broadcast %cst_28 : f32 to vector<8x128xf32>
    %84 = arith.select %79, %82, %83 : vector<8x128xi1>, vector<8x128xf32>
    %cst_29 = arith.constant dense<0.000000e+00> : vector<8x128xf32>
    %85 = tpu.matmul %84, %1, %cst_29 {dimension_numbers = #tpu.dot_dimension_numbers<[1], [0], [0], [1], [0, 0, 1, 1], [], []>} : vector<8x128xf32>, vector<128x128xf32>, vector<8x128xf32> -> vector<8x128xf32>
    %cst_30 = arith.constant dense<0.000000e+00> : vector<8xf32>
    %86 = vector.multi_reduction <add>, %84, %cst_30 [1] : vector<8x128xf32> to vector<8xf32>
    %87 = vector.shape_cast %86 : vector<8xf32> to vector<8x1xf32>
    %88 = tpu.reciprocal %87 : vector<8x1xf32> -> vector<8x1xf32>
    %89 = vector.broadcast %88 : vector<8x1xf32> to vector<8x128xf32>
    %90 = arith.mulf %85, %89 : vector<8x128xf32>
    %c0_31 = arith.constant 0 : index
    %c0_32 = arith.constant 0 : index
    %91 = vector.load %arg4[%c0_31, %c0_32] : memref<8x128xf32, #tpu.memory_space<vmem>>, vector<8x128xf32>
    tpu.vector_store %arg4[%c0_31, %c0_32], %90 {strides = array<i32>} : memref<8x128xf32, #tpu.memory_space<vmem>>, vector<8x128xf32>,
    return
  }
  func.func @transform_0(%arg0: i32) -> (i32, i32) {
    %c0_i32 = arith.constant 0 : i32
    %c0_i32_0 = arith.constant 0 : i32
    return %arg0, %c0_i32 : i32, i32
  }
  func.func @transform_1(%arg0: i32) -> (i32, i32) {
    %c0_i32 = arith.constant 0 : i32
    %c0_i32_0 = arith.constant 0 : i32
    %c0_i32_1 = arith.constant 0 : i32
    return %c0_i32, %c0_i32_0 : i32, i32
  }
  func.func @transform_2(%arg0: i32) -> (i32, i32) {
    %c0_i32 = arith.constant 0 : i32
    %c0_i32_0 = arith.constant 0 : i32
    %c0_i32_1 = arith.constant 0 : i32
    return %c0_i32, %c0_i32_0 : i32, i32
  }
  func.func @transform_3(%arg0: i32) -> (i32, i32) {
    %c0_i32 = arith.constant 0 : i32
    %c0_i32_0 = arith.constant 0 : i32
    return %arg0, %c0_i32 : i32, i32
  }
}

</mosaic_0001>

<bundles_post_ra>
// kernel: memory_module_forward.1
= control target key start
LH: loop header
LB: loop body
LE: loop exit
PB: predicated region body
PF: predicated region fallthrough
CT: control target
= control target key end

     0   :  { %s293_s0 = inlined_call_operand.vmem [shape: f32[8,128], index: 0, kind: input, shape index: {}]   ;;  %s294_s1 = inlined_call_operand.vmem [shape: f32[128,128], index: 1, kind: input, shape index: {}]   ;;  %s295_s2 = inlined_call_operand.vmem [shape: f32[1,128], index: 2, kind: input, shape index: {}]   ;;  %s296_s3 = inlined_call_operand.hbm [shape: f32[8,128], index: 3, kind: output, shape index: {}]  }
   0x1   :  { %v234_v0 = vld [vmem:[%s293_s0] sm:$0xff]  ;;  %v31_v1 = vld [vmem:[%s294_s1 + $0x78] sm:$0xff]  ;;  %v30_v3 = vld [vmem:[%s294_s1 + $0x70] sm:$0xff] }
   0x2   :  { %v33_v2 = vmul.f32 %v234_v0, %v234_v0  ;;  %48 = vmatpush.xpose.msra.mxu0 %v31_v1  ;;  %121 = vmatpush.msra.mxu1 %v31_v1  ;;  %v29_v4 = vld [vmem:[%s294_s1 + $0x68] sm:$0xff] }
   0x4   :  { %34 = vadd.xlane.f32.xlu0 %v33_v2  ;;  %122 = vmatpush.msra.mxu1 %v30_v3 }
   0x5   :  { %8 = vsyncpa [#allocation3], 0  ;;  %v28_v5 = vld [vmem:[%s294_s1 + $0x60] sm:$0xff]  ;;  %v27_v6 = vld [vmem:[%s294_s1 + $0x58] sm:$0xff]  ;;  %v72_v28 = vlaneseq  ;;  %s166_s21 = sshll.u32 %s296_s3, 4  ;;  %s167_s21 = int_to_ptr.hbm [resolvable:$true] %s166_s21 }
   0x6   :  { %49 = vmatpush.xpose.msra.mxu0 %v30_v3  ;;  %123 = vmatpush.msra.mxu1 %v29_v4  ;;  %v26_v7 = vld [vmem:[%s294_s1 + $0x50] sm:$0xff]  ;;  %v25_v8 = vld [vmem:[%s294_s1 + $0x48] sm:$0xff]  ;;  %v24_v9 = vld [vmem:[%s294_s1 + $0x40] sm:$0xff] }
   0x7   :  { %v23_v10 = vld [vmem:[%s294_s1 + $0x38] sm:$0xff]  ;;  %v22_v11 = vld [vmem:[%s294_s1 + $0x30] sm:$0xff]  ;;  %v21_v12 = vld [vmem:[%s294_s1 + $0x28] sm:$0xff]  ;;  %v73_v29 = vand.u32 127, %v72_v28 }
   0x8   :  { %124 = vmatpush.msra.mxu1 %v28_v5  ;;  %v20_v13 = vld [vmem:[%s294_s1 + $0x20] sm:$0xff]  ;;  %v19_v14 = vld [vmem:[%s294_s1 + $0x18] sm:$0xff]  ;;  %v18_v15 = vld [vmem:[%s294_s1 + $0x10] sm:$0xff] }
   0x9   :  { %v17_v16 = vld [vmem:[%s294_s1 + $0x8] sm:$0xff]  ;;  %v16_v17 = vld [vmem:[%s294_s1] sm:$0xff]  ;;  %vm74_vm3 = vcmp.lt.s32.totalorder %v73_v29, 100 }
   0xa   :  { %50 = vmatpush.xpose.msra.mxu0 %v29_v4  ;;  %125 = vmatpush.msra.mxu1 %v27_v6  ;;  %v177_v30 = vld [vmem:[%s295_s2] ss:$0 sm:$0xff]  ;;  %s210_s2 = smov [#allocation2]  }
   0xb   :  { %s164_s19 = sshll.u32 %s210_s2, 4  ;;  %s165_s19 = int_to_ptr.vmem [resolvable:$true] %s164_s19 }
   0xc   :  { %126 = vmatpush.msra.mxu1 %v26_v7 }
   0xe   :  { %51 = vmatpush.xpose.msra.mxu0 %v28_v5  ;;  %127 = vmatpush.msra.mxu1 %v25_v8 }
  0x10   :  { %128 = vmatpush.msra.mxu1 %v24_v9 }
  0x12   :  { %52 = vmatpush.xpose.msra.mxu0 %v27_v6  ;;  %129 = vmatpush.msra.mxu1 %v23_v10 }
  0x14   :  { %130 = vmatpush.msra.mxu1 %v22_v11 }
  0x16   :  { %53 = vmatpush.xpose.msra.mxu0 %v26_v7  ;;  %131 = vmatpush.msra.mxu1 %v21_v12 }
  0x18   :  { %132 = vmatpush.msra.mxu1 %v20_v13 }
  0x1a   :  { %54 = vmatpush.xpose.msra.mxu0 %v25_v8  ;;  %133 = vmatpush.msra.mxu1 %v19_v14 }
  0x1c   :  { %134 = vmatpush.msra.mxu1 %v18_v15 }
  0x1e   :  { %55 = vmatpush.xpose.msra.mxu0 %v24_v9  ;;  %135 = vmatpush.msra.mxu1 %v17_v16 }
  0x20   :  { %136 = vmatpush.msra.mxu1 %v16_v17 }
  0x22   :  { %56 = vmatpush.xpose.msra.mxu0 %v23_v10 }
  0x26   :  { %57 = vmatpush.xpose.msra.mxu0 %v22_v11 }
  0x2a   :  { %58 = vmatpush.xpose.msra.mxu0 %v21_v12 }
  0x2e   :  { %59 = vmatpush.xpose.msra.mxu0 %v20_v13 }
  0x32   :  { %60 = vmatpush.xpose.msra.mxu0 %v19_v14 }
  0x36   :  { %61 = vmatpush.xpose.msra.mxu0 %v18_v15 }
  0x3a   :  { %62 = vmatpush.xpose.msra.mxu0 %v17_v16 }
  0x3e   :  { %63 = vmatpush.xpose.msra.mxu0 %v16_v17 }
  0x77   :  { %v35_v18 = vpop.xlane.xlu0 %34 }
  0x78   :  { %v36_v19 = vmax.f32 %v35_v18, 1e-24 }
  0x7a   :  { %178 = vrsqrt.f32 %v36_v19  ;;  %vm43_vm1 = vweird.f32 %v36_v19 }
  0x80   :  { %v179_v20 = vpop.eup %178 }
  0x81   :  { %v38_v21 = vmul.f32 %v179_v20, %v36_v19  ;;  %vm44_vm0 = vweird.f32 %v179_v20 }
  0x82   :  { %vm45_vm2 = vmor %vm43_vm1, %vm44_vm0 }
  0x83   :  { %v39_v22 = vmul.f32 %v179_v20, %v38_v21 }
  0x85   :  { %v40_v23 = vmul.f32 0.5, %v39_v22 }
  0x87   :  { %v41_v24 = vsub.f32 1.5, %v40_v23 }
  0x89   :  { %v42_v25 = vmul.f32 %v179_v20, %v41_v24 }
  0x8b   :  { %v46_v26 = vsel %vm45_vm2, %v179_v20, %v42_v25 }
  0x8c   :  { %v47_v27 = vmul.f32 %v46_v26, %v234_v0 }
  0x8e   :  { %64 = vmatmul.f32.vlgmr.msra.gmra.mxu0 %v47_v27 }
 0x10b   :  { %v65_v31 = vpop.f32.mrf.mxu0 }
 0x10c   :  { %v71_v32 = vmul.f32 %v177_v30, %v65_v31 }
 0x10e   :  { %v75_v33 = vsel %vm74_vm3, %v71_v32, -1e+30 }
 0x10f   :  { %76 = vmax.xlane.f32.xlu0 %v75_v33 }
 0x182   :  { %v77_v34 = vpop.xlane.xlu0 %76 }
 0x183   :  { %vm78_vm4 = vcmp.eq.f32.partialorder %v75_v33, %v77_v34  ;;  %v117_v52 = vsub.f32 %v75_v33, %v77_v34 }
 0x184   :  { %v79_v35 = vsel %vm78_vm4, -1e+30, %v75_v33 }
 0x185   :  { %80 = vmax.xlane.f32.xlu1 %v79_v35  ;;  %v118_v53 = vmul.f32 1.442695, %v117_v52 }
 0x187   :  { %180 = vpow2.f32 %v118_v53 }
 0x18d   :  { %v181_v56 = vpop.eup %180 }
 0x1f8   :  { %v81_v36 = vpop.xlane.xlu1 %80 }
 0x1f9   :  { %vm82_vm5 = vcmp.eq.f32.partialorder %v79_v35, %v81_v36 }
 0x1fa   :  { %v83_v37 = vsel %vm82_vm5, -1e+30, %v79_v35 }
 0x1fb   :  { %84 = vmax.xlane.f32.xlu1 %v83_v37 }
 0x26e   :  { %v85_v38 = vpop.xlane.xlu1 %84 }
 0x26f   :  { %vm86_vm6 = vcmp.eq.f32.partialorder %v83_v37, %v85_v38 }
 0x270   :  { %v87_v39 = vsel %vm86_vm6, -1e+30, %v83_v37 }
 0x271   :  { %88 = vmax.xlane.f32.xlu2 %v87_v39 }
 0x2e4   :  { %v89_v40 = vpop.xlane.xlu2 %88 }
 0x2e5   :  { %vm90_vm7 = vcmp.eq.f32.partialorder %v87_v39, %v89_v40 }
 0x2e6   :  { %v91_v41 = vsel %vm90_vm7, -1e+30, %v87_v39 }
 0x2e7   :  { %92 = vmax.xlane.f32.xlu2 %v91_v41 }
 0x35a   :  { %v93_v42 = vpop.xlane.xlu2 %92 }
 0x35b   :  { %vm94_vm8 = vcmp.eq.f32.partialorder %v91_v41, %v93_v42 }
 0x35c   :  { %v95_v43 = vsel %vm94_vm8, -1e+30, %v91_v41 }
 0x35d   :  { %96 = vmax.xlane.f32.xlu0 %v95_v43 }
 0x3d0   :  { %v97_v44 = vpop.xlane.xlu0 %96 }
 0x3d1   :  { %vm98_vm9 = vcmp.eq.f32.partialorder %v95_v43, %v97_v44 }
 0x3d2   :  { %v99_v45 = vsel %vm98_vm9, -1e+30, %v95_v43 }
 0x3d3   :  { %100 = vmax.xlane.f32.xlu1 %v99_v45 }
 0x446   :  { %v101_v46 = vpop.xlane.xlu1 %100 }
 0x447   :  { %vm102_vm10 = vcmp.eq.f32.partialorder %v99_v45, %v101_v46 }
 0x448   :  { %v103_v47 = vsel %vm102_vm10, -1e+30, %v99_v45 }
 0x449   :  { %104 = vmax.xlane.f32.xlu2 %v103_v47 }
 0x4bc   :  { %v105_v48 = vpop.xlane.xlu2 %104 }
 0x4bd   :  { %vm106_vm11 = vcmp.eq.f32.partialorder %v103_v47, %v105_v48 }
 0x4be   :  { %v107_v49 = vsel %vm106_vm11, -1e+30, %v103_v47 }
 0x4bf   :  { %108 = vmax.xlane.f32.xlu0 %v107_v49 }
 0x532   :  { %v109_v50 = vpop.xlane.xlu0 %108 }
 0x533   :  { %vm110_vm12 = vcmp.eq.f32.partialorder %v107_v49, %v109_v50 }
 0x534   :  { %v111_v51 = vsel %vm110_vm12, -1e+30, %v107_v49 }
 0x535   :  { %112 = vmax.xlane.f32.xlu1 %v111_v51 }
 0x5a8   :  { %v113_v54 = vpop.xlane.xlu1 %112 }
 0x5a9   :  { %vm114_vm13 = vcmp.eq.f32.partialorder %v111_v51, %v113_v54 }
 0x5aa   :  { %v115_v55 = vsel %vm114_vm13, -1e+30, %v111_v51 }
 0x5ab   :  { %vm116_vm14 = vcmp.ne.f32.partialorder %v115_v55, %v75_v33 }
 0x5ac   :  { %175 = vmatmul.msk.f32.vlgmr.msra.gmra.mxu1 %vm116_vm14, %v181_v56  ;;  %v120_v57 = vsel %vm116_vm14, %v181_v56, 0.0 }
 0x5ad   :  { %141 = vadd.xlane.f32.xlu2 %v120_v57 }
 0x620   :  { %v142_v58 = vpop.xlane.xlu2 %141 }
 0x621   :  { %182 = vrcp.f32 %v142_v58  ;;  %v154_v62 = vand.u32 2147483648, %v142_v58  ;;  %v152_v0 = vand.u32 2147483647, %v142_v58  ;;  %vm148_vm0 = vweird.f32 %v142_v58 }
 0x623   :  { %v155_v2 = vor.u32 1.1754944e-38, %v154_v62  ;;  %vm153_vm2 = vcmp.eq.f32.partialorder %v152_v0, 8.507059e+37 }
 0x627   :  { %v183_v59 = vpop.eup %182 }
 0x628   :  { %v144_v60 = vmul.f32 %v183_v59, %v142_v58  ;;  %vm149_vm15 = vweird.f32 %v183_v59 }
 0x629   :  { %vm150_vm1 = vmor %vm148_vm0, %vm149_vm15  ;;  %v138_v4 = vpop.f32.mrf.mxu1 }
 0x62a   :  { %v145_v61 = vsub.f32 1.0, %v144_v60 }
 0x62c   :  { %v146_v63 = vmul.f32 %v183_v59, %v145_v61 }
 0x62e   :  { %v147_v1 = vadd.f32 %v183_v59, %v146_v63 }
 0x630   :  { %v151_v3 = vsel %vm150_vm1, %v183_v59, %v147_v1 }
 0x631   :  { %v156_v5 = vsel %vm153_vm2, %v155_v2, %v151_v3 }
 0x632   :  { %v157_v6 = vmul.f32 %v156_v5, %v138_v4 }
 0x634   :  { %158 = vst [vmem:[#allocation2] sm:$0xff] %v157_v6 }
 0x635   :  { %169 = dma.vmem_to_hbm [thread:$0]  %s165_s19, 128, %s167_s21, [#allocation3]  }
 0x636   :  { %208 = dma.done.wait [#allocation3], 128  }
 0x637   :  { %209 = vsyncadd [#allocation3], 4294967168 }
 0x638   :  { %174 = vsyncpa [#allocation3], 1 }

</bundles_post_ra>
